<compile_context>
chip_gen: v7x
topology: tpu7x:2x2x1
jax: 0.10.0
libtpu: 0.0.40
codegen_flags: <defaults>
</compile_context>

<pallas_src>
import numpy as np
import jax
import jax.numpy as jnp
from jax.experimental import pallas as pl
from jax.experimental.pallas import tpu as pltpu

N = 2  # batch (kernel lane layout hard-codes N*64 = 128 columns)


# ---------------------------------------------------------------------------
# Single fused kernel: 3 x (conv-as-matmul + maxpool + bias + ReLU)
# Column index c of every [*, 128] value encodes (n, i, j) = (c>>6, (c>>3)&7, c&7).
# ---------------------------------------------------------------------------
def _encoder_kernel(x1t_ref, wb_ref, o_ref, s2a_ref, s2p_ref, s3a_ref):
    f32 = jnp.float32

    # lane-index masks (computed once, reused by layers 2 and 3)
    c = jax.lax.broadcasted_iota(jnp.int32, (1, 128), 1)
    j = c & 7
    i = (c >> 3) & 7
    mj = j > 0
    mi = i > 0
    mij = jnp.logical_and(mi, mj)
    m_valid = jnp.logical_and((i & 1) == 0, (j & 1) == 0)   # even (i, j) lanes
    m_n = [(c >> 6) == n for n in range(N)]
    neg = jnp.float32(-jnp.inf)

    # packed params: rows 0:8 layer1, 8:24 layer2, 24:56 layer3; bias in col 64
    w1t = wb_ref[0:8, 0:4]
    b1 = wb_ref[0:8, 64:65]
    w2t = wb_ref[8:24, 0:32]
    b2 = wb_ref[8:24, 64:65]
    w3t = wb_ref[24:56, 0:64]
    b3 = wb_ref[24:56, 64:65]

    # ---------- layer 1: Conv(1->8,k2,p1) + MaxPool(2) + bias + ReLU --------
    # x1t columns ordered (pool-offset e, n, i, j): pool = max of 4 aligned
    # 128-lane blocks.
    c1 = jnp.dot(w1t, x1t_ref[...], preferred_element_type=f32)          # [8,512]
    m1 = jnp.maximum(jnp.maximum(c1[:, 0:128], c1[:, 128:256]),
                     jnp.maximum(c1[:, 256:384], c1[:, 384:512]))        # [8,128]
    h1 = jnp.maximum(m1 + b1, 0.0)                                       # [8,128]

    # ---------- layer 2: Conv(8->16,k2,p1) via shifted taps ------------------
    # tap (kh,kw) needs h1 at (i+kh-1, j+kw-1): right-shift of the flattened
    # lane index by 9/8/1/0, realized as one aligned staged store + offset loads.
    s2a_ref[...] = jnp.zeros_like(s2a_ref)
    s2a_ref[:, 128:256] = h1
    t0 = jnp.where(mij, s2a_ref[:, 128 - 9:256 - 9], 0.0)    # tap (0,0)
    t1 = jnp.where(mi, s2a_ref[:, 128 - 8:256 - 8], 0.0)     # tap (0,1)
    t2 = jnp.where(mj, s2a_ref[:, 128 - 1:256 - 1], 0.0)     # tap (1,0)
    x2 = jnp.concatenate([t0, t1, t2, h1], axis=0)           # [32,128]
    c2 = jnp.dot(w2t, x2, preferred_element_type=f32)        # [16,128]

    # 2x2 max-pool: max over lane offsets {0,1,8,9}; then bias + ReLU.
    # Valid pooled values live at even (i, j) lanes; the rest is never used.
    s2p_ref[...] = jnp.zeros_like(s2p_ref)
    s2p_ref[:, 0:128] = c2
    p2 = jnp.maximum(jnp.maximum(c2, s2p_ref[:, 1:129]),
                     jnp.maximum(s2p_ref[:, 8:136], s2p_ref[:, 9:137]))
    h2 = jnp.maximum(p2 + b2, 0.0)                           # [16,128] (sparse)

    # ---------- layer 3: Conv(16->32,k2,p1) via shifted taps -----------------
    # neighbors of the sparse 4x4 grid are at lane offsets 18/16/2/0.
    s3a_ref[...] = jnp.zeros_like(s3a_ref)
    s3a_ref[:, 128:256] = h2
    u0 = jnp.where(mij, s3a_ref[:, 128 - 18:256 - 18], 0.0)  # tap (0,0)
    u1 = jnp.where(mi, s3a_ref[:, 128 - 16:256 - 16], 0.0)   # tap (0,1)
    u2 = jnp.where(mj, s3a_ref[:, 128 - 2:256 - 2], 0.0)     # tap (1,0)
    x3 = jnp.concatenate([u0, u1, u2, h2], axis=0)           # [64,128]
    c3 = jnp.dot(w3t, x3, preferred_element_type=f32)        # [32,128]

    # ---------- MaxPool(4) over the 16 valid positions per image + bias+ReLU
    outs = []
    for n in range(N):
        sel = jnp.logical_and(m_valid, m_n[n])
        outs.append(jnp.max(jnp.where(sel, c3, neg), axis=1, keepdims=True))  # [32,1]
    cols2 = jax.lax.broadcasted_iota(jnp.int32, (32, N), 1)
    out = outs[0]
    for n in range(1, N):
        out = jnp.where(cols2 == n, outs[n], out)            # [32,N]
    o_ref[...] = jnp.maximum(out + b3, 0.0)                  # single store


# ---------------------------------------------------------------------------
# Wrapper glue (pure data movement, done once per call)
# ---------------------------------------------------------------------------
def _build_x1t(x_nchw):
    """Layer-1 im2col, transposed: [4 taps, 512] with columns (pool-off, n, i, j).
    Only the top/left zero pad matters: the bottom/right conv row/col is
    dropped by the floor-mode MaxPool."""
    x = x_nchw[:, 0, :, :]                                # [N,16,16]
    xp = jnp.pad(x, ((0, 0), (1, 0), (1, 0)))             # [N,17,17]
    rows = []
    for kh in range(2):
        for kw in range(2):
            blocks = []
            for dy in range(2):
                for dx in range(2):
                    s = xp[:, dy + kh:dy + kh + 15:2, dx + kw:dx + kw + 15:2]  # [N,8,8]
                    blocks.append(s.reshape(N * 64))
            rows.append(jnp.concatenate(blocks, axis=0))   # [512]
    return jnp.stack(rows, axis=0)                         # [4,512]


def _pack_params(w1, b1, w2, b2, w3, b3):
    """One [56,65] slab: per-layer W^T ([Cout, K*K*Cin], (kh,kw,cin) column
    order) in cols [0:K*K*Cin), bias in col 64."""
    f32 = jnp.float32

    def wt(w):
        co = w.shape[0]
        return jnp.transpose(w, (0, 2, 3, 1)).reshape(co, -1).astype(f32)

    def row(wt_, b):
        pad = jnp.zeros((wt_.shape[0], 64 - wt_.shape[1]), f32)
        return jnp.concatenate([wt_, pad, b.astype(f32)[:, None]], axis=1)

    return jnp.concatenate(
        [row(wt(w1), b1), row(wt(w2), b2), row(wt(w3), b3)], axis=0)   # [56,65]


@jax.jit
def encoder_pallas(x_nchw, w1, b1, w2, b2, w3, b3):
    x1t = _build_x1t(x_nchw)                    # [4, 512]
    wb = _pack_params(w1, b1, w2, b2, w3, b3)   # [56, 65]
    out = pl.pallas_call(
        _encoder_kernel,
        out_shape=jax.ShapeDtypeStruct((32, N), jnp.float32),
        in_specs=[pl.BlockSpec(memory_space=pltpu.MemorySpace.VMEM)] * 2,
        out_specs=pl.BlockSpec(memory_space=pltpu.MemorySpace.VMEM),
        scratch_shapes=[
            pltpu.VMEM((8, 256), jnp.float32),    # layer-2 tap staging
            pltpu.VMEM((16, 256), jnp.float32),   # layer-2 pool staging
            pltpu.VMEM((16, 256), jnp.float32),   # layer-3 tap staging
        ],
    )(x1t, wb)
    return jnp.transpose(out).reshape(N, 32, 1, 1)          # NCHW [N,32,1,1]


# ---------------------------------------------------------------------------
# Pure-JAX reference (correctness check only)
# ---------------------------------------------------------------------------
def encoder_ref(x_nchw, params):
    h = jnp.transpose(x_nchw, (0, 2, 3, 1))
    pools = (2, 2, 4)
    for (w, b), pool in zip(params, pools):
        y = jax.lax.conv_general_dilated(
            h, jnp.transpose(w, (2, 3, 1, 0)),
            window_strides=(1, 1), padding=((1, 1), (1, 1)),
            dimension_numbers=('NHWC', 'HWIO', 'NHWC'))
        y = jnp.maximum(y + b.reshape(1, 1, 1, -1), 0.0)
        y = jax.lax.reduce_window(y, -jnp.inf, jax.lax.max,
                                  (1, pool, pool, 1), (1, pool, pool, 1),
                                  'VALID')
        h = y
    return jnp.transpose(h, (0, 3, 1, 2))


def make_params(key):
    cfg = [(1, 8), (8, 16), (16, 32)]          # (cin, cout), k=2 for all
    params = []
    for i, (cin, cout) in enumerate(cfg):
        kw_, kb_ = jax.random.split(jax.random.fold_in(key, i))
        bound = 1.0 / np.sqrt(cin * 2 * 2)
        w = jax.random.uniform(kw_, (cout, cin, 2, 2), jnp.float32,
                               minval=-bound, maxval=bound)
        b = jax.random.uniform(kb_, (cout,), jnp.float32,
                               minval=-bound, maxval=bound)
        params.append((w, b))
    return params


if __name__ == "__main__":
    key = jax.random.PRNGKey(0)
    kx, kp = jax.random.split(key)
    x = jax.random.normal(kx, (N, 1, 16, 16), jnp.float32)   # NCHW like PyTorch
    params = make_params(kp)
    (w1, b1), (w2, b2), (w3, b3) = params

    out = jax.block_until_ready(encoder_pallas(x, w1, b1, w2, b2, w3, b3))
    ref = jax.block_until_ready(encoder_ref(x, params))
    assert out.shape == (N, 32, 1, 1), out.shape
    np.testing.assert_allclose(np.asarray(out), np.asarray(ref),
                               rtol=1e-4, atol=1e-4)
    # TODO(synk): decoder (ConvTranspose2d stack) is unreachable in forward()
    # (dead code after `return x`), so it is intentionally not implemented.
    print("KERNEL_OK")
</pallas_src>

<mosaic_0001>
module attributes {stable_mosaic.version = 11 : i64} {
  func.func @_encoder_kernel(%arg0: memref<4x512xf32, #tpu.memory_space<vmem>>, %arg1: memref<56x65xf32, #tpu.memory_space<vmem>>, %arg2: memref<32x2xf32, #tpu.memory_space<vmem>>, %arg3: memref<8x256xf32, #tpu.memory_space<vmem>>, %arg4: memref<16x256xf32, #tpu.memory_space<vmem>>, %arg5: memref<16x256xf32, #tpu.memory_space<vmem>>) attributes {dimension_semantics = [], scalar_prefetch = 0 : i64, scratch_operands = 3 : i64, tpu.core_type = #tpu.core_type<tc>} {
    %0 = tpu.iota {dimensions = array<i32: 1>} : vector<1x128xi32>
    %c7_i32 = arith.constant 7 : i32
    %1 = vector.broadcast %c7_i32 : i32 to vector<1x128xi32>
    %2 = arith.andi %0, %1 : vector<1x128xi32>
    %c3_i32 = arith.constant 3 : i32
    %3 = vector.broadcast %c3_i32 : i32 to vector<1x128xi32>
    %4 = arith.shrsi %0, %3 : vector<1x128xi32>
    %c7_i32_0 = arith.constant 7 : i32
    %5 = vector.broadcast %c7_i32_0 : i32 to vector<1x128xi32>
    %6 = arith.andi %4, %5 : vector<1x128xi32>
    %c0_i32 = arith.constant 0 : i32
    %7 = vector.broadcast %c0_i32 : i32 to vector<1x128xi32>
    %8 = arith.cmpi sgt, %2, %7 : vector<1x128xi32>
    %c0_i32_1 = arith.constant 0 : i32
    %9 = vector.broadcast %c0_i32_1 : i32 to vector<1x128xi32>
    %10 = arith.cmpi sgt, %6, %9 : vector<1x128xi32>
    %11 = arith.andi %10, %8 : vector<1x128xi1>
    %c1_i32 = arith.constant 1 : i32
    %12 = vector.broadcast %c1_i32 : i32 to vector<1x128xi32>
    %13 = arith.andi %6, %12 : vector<1x128xi32>
    %c0_i32_2 = arith.constant 0 : i32
    %14 = vector.broadcast %c0_i32_2 : i32 to vector<1x128xi32>
    %15 = arith.cmpi eq, %13, %14 : vector<1x128xi32>
    %c1_i32_3 = arith.constant 1 : i32
    %16 = vector.broadcast %c1_i32_3 : i32 to vector<1x128xi32>
    %17 = arith.andi %2, %16 : vector<1x128xi32>
    %c0_i32_4 = arith.constant 0 : i32
    %18 = vector.broadcast %c0_i32_4 : i32 to vector<1x128xi32>
    %19 = arith.cmpi eq, %17, %18 : vector<1x128xi32>
    %20 = arith.andi %15, %19 : vector<1x128xi1>
    %c6_i32 = arith.constant 6 : i32
    %21 = vector.broadcast %c6_i32 : i32 to vector<1x128xi32>
    %22 = arith.shrsi %0, %21 : vector<1x128xi32>
    %c0_i32_5 = arith.constant 0 : i32
    %23 = vector.broadcast %c0_i32_5 : i32 to vector<1x128xi32>
    %24 = arith.cmpi eq, %22, %23 : vector<1x128xi32>
    %c6_i32_6 = arith.constant 6 : i32
    %25 = vector.broadcast %c6_i32_6 : i32 to vector<1x128xi32>
    %26 = arith.shrsi %0, %25 : vector<1x128xi32>
    %c1_i32_7 = arith.constant 1 : i32
    %27 = vector.broadcast %c1_i32_7 : i32 to vector<1x128xi32>
    %28 = arith.cmpi eq, %26, %27 : vector<1x128xi32>
    %c0 = arith.constant 0 : index
    %c0_8 = arith.constant 0 : index
    %29 = vector.load %arg1[%c0, %c0_8] : memref<56x65xf32, #tpu.memory_space<vmem>>, vector<8x4xf32>
    %c0_9 = arith.constant 0 : index
    %c64 = arith.constant 64 : index
    %30 = vector.load %arg1[%c0_9, %c64] : memref<56x65xf32, #tpu.memory_space<vmem>>, vector<8x1xf32>
    %c8 = arith.constant 8 : index
    %c0_10 = arith.constant 0 : index
    %31 = vector.load %arg1[%c8, %c0_10] : memref<56x65xf32, #tpu.memory_space<vmem>>, vector<16x32xf32>
    %c8_11 = arith.constant 8 : index
    %c64_12 = arith.constant 64 : index
    %32 = vector.load %arg1[%c8_11, %c64_12] : memref<56x65xf32, #tpu.memory_space<vmem>>, vector<16x1xf32>
    %c24 = arith.constant 24 : index
    %c0_13 = arith.constant 0 : index
    %33 = vector.load %arg1[%c24, %c0_13] : memref<56x65xf32, #tpu.memory_space<vmem>>, vector<32x64xf32>
    %c24_14 = arith.constant 24 : index
    %c64_15 = arith.constant 64 : index
    %34 = vector.load %arg1[%c24_14, %c64_15] : memref<56x65xf32, #tpu.memory_space<vmem>>, vector<32x1xf32>
    %c0_16 = arith.constant 0 : index
    %c0_17 = arith.constant 0 : index
    %35 = vector.load %arg0[%c0_16, %c0_17] : memref<4x512xf32, #tpu.memory_space<vmem>>, vector<4x512xf32>
    %cst = arith.constant dense<0.000000e+00> : vector<8x512xf32>
    %36 = tpu.matmul %29, %35, %cst {dimension_numbers = #tpu.dot_dimension_numbers<[1], [0], [0], [1], [0, 0, 1, 1], [], []>} : vector<8x4xf32>, vector<4x512xf32>, vector<8x512xf32> -> vector<8x512xf32>
    %37 = vector.extract_strided_slice %36 {offsets = [0, 0], sizes = [8, 128], strides = [1, 1]} : vector<8x512xf32> to vector<8x128xf32>
    %38 = vector.extract_strided_slice %36 {offsets = [0, 128], sizes = [8, 128], strides = [1, 1]} : vector<8x512xf32> to vector<8x128xf32>
    %39 = arith.maximumf %37, %38 : vector<8x128xf32>
    %40 = vector.extract_strided_slice %36 {offsets = [0, 256], sizes = [8, 128], strides = [1, 1]} : vector<8x512xf32> to vector<8x128xf32>
    %41 = vector.extract_strided_slice %36 {offsets = [0, 384], sizes = [8, 128], strides = [1, 1]} : vector<8x512xf32> to vector<8x128xf32>
    %42 = arith.maximumf %40, %41 : vector<8x128xf32>
    %43 = arith.maximumf %39, %42 : vector<8x128xf32>
    %44 = vector.broadcast %30 : vector<8x1xf32> to vector<8x128xf32>
    %45 = arith.addf %43, %44 : vector<8x128xf32>
    %cst_18 = arith.constant 0.000000e+00 : f32
    %46 = vector.broadcast %cst_18 : f32 to vector<8x128xf32>
    %47 = arith.maximumf %45, %46 : vector<8x128xf32>
    %cst_19 = arith.constant 0.000000e+00 : f32
    %48 = vector.broadcast %cst_19 : f32 to vector<8x256xf32>
    %c0_20 = arith.constant 0 : index
    %c0_21 = arith.constant 0 : index
    %49 = vector.load %arg3[%c0_20, %c0_21] : memref<8x256xf32, #tpu.memory_space<vmem>>, vector<8x256xf32>
    tpu.vector_store %arg3[%c0_20, %c0_21], %48 {strides = array<i32>} : memref<8x256xf32, #tpu.memory_space<vmem>>, vector<8x256xf32>,
    %c0_22 = arith.constant 0 : index
    %c128 = arith.constant 128 : index
    %50 = vector.load %arg3[%c0_22, %c128] : memref<8x256xf32, #tpu.memory_space<vmem>>, vector<8x128xf32>
    tpu.vector_store %arg3[%c0_22, %c128], %47 {strides = array<i32>} : memref<8x256xf32, #tpu.memory_space<vmem>>, vector<8x128xf32>,
    %c0_23 = arith.constant 0 : index
    %c119 = arith.constant 119 : index
    %51 = vector.load %arg3[%c0_23, %c119] : memref<8x256xf32, #tpu.memory_space<vmem>>, vector<8x128xf32>
    %cst_24 = arith.constant 0.000000e+00 : f32
    %52 = vector.shape_cast %11 : vector<1x128xi1> to vector<1x128xi1>
    %53 = vector.broadcast %52 : vector<1x128xi1> to vector<8x128xi1>
    %54 = vector.broadcast %cst_24 : f32 to vector<8x128xf32>
    %55 = arith.select %53, %51, %54 : vector<8x128xi1>, vector<8x128xf32>
    %c0_25 = arith.constant 0 : index
    %c120 = arith.constant 120 : index
    %56 = vector.load %arg3[%c0_25, %c120] : memref<8x256xf32, #tpu.memory_space<vmem>>, vector<8x128xf32>
    %cst_26 = arith.constant 0.000000e+00 : f32
    %57 = vector.shape_cast %10 : vector<1x128xi1> to vector<1x128xi1>
    %58 = vector.broadcast %57 : vector<1x128xi1> to vector<8x128xi1>
    %59 = vector.broadcast %cst_26 : f32 to vector<8x128xf32>
    %60 = arith.select %58, %56, %59 : vector<8x128xi1>, vector<8x128xf32>
    %c0_27 = arith.constant 0 : index
    %c127 = arith.constant 127 : index
    %61 = vector.load %arg3[%c0_27, %c127] : memref<8x256xf32, #tpu.memory_space<vmem>>, vector<8x128xf32>
    %cst_28 = arith.constant 0.000000e+00 : f32
    %62 = vector.shape_cast %8 : vector<1x128xi1> to vector<1x128xi1>
    %63 = vector.broadcast %62 : vector<1x128xi1> to vector<8x128xi1>
    %64 = vector.broadcast %cst_28 : f32 to vector<8x128xf32>
    %65 = arith.select %63, %61, %64 : vector<8x128xi1>, vector<8x128xf32>
    %66 = tpu.concatenate %55, %60, %65, %47 in 0 : vector<8x128xf32>, vector<8x128xf32>, vector<8x128xf32>, vector<8x128xf32> -> vector<32x128xf32>
    %cst_29 = arith.constant dense<0.000000e+00> : vector<16x128xf32>
    %67 = tpu.matmul %31, %66, %cst_29 {dimension_numbers = #tpu.dot_dimension_numbers<[1], [0], [0], [1], [0, 0, 1, 1], [], []>} : vector<16x32xf32>, vector<32x128xf32>, vector<16x128xf32> -> vector<16x128xf32>
    %cst_30 = arith.constant 0.000000e+00 : f32
    %68 = vector.broadcast %cst_30 : f32 to vector<16x256xf32>
    %c0_31 = arith.constant 0 : index
    %c0_32 = arith.constant 0 : index
    %69 = vector.load %arg4[%c0_31, %c0_32] : memref<16x256xf32, #tpu.memory_space<vmem>>, vector<16x256xf32>
    tpu.vector_store %arg4[%c0_31, %c0_32], %68 {strides = array<i32>} : memref<16x256xf32, #tpu.memory_space<vmem>>, vector<16x256xf32>,
    %c0_33 = arith.constant 0 : index
    %c0_34 = arith.constant 0 : index
    %70 = vector.load %arg4[%c0_33, %c0_34] : memref<16x256xf32, #tpu.memory_space<vmem>>, vector<16x128xf32>
    tpu.vector_store %arg4[%c0_33, %c0_34], %67 {strides = array<i32>} : memref<16x256xf32, #tpu.memory_space<vmem>>, vector<16x128xf32>,
    %c0_35 = arith.constant 0 : index
    %c1 = arith.constant 1 : index
    %71 = vector.load %arg4[%c0_35, %c1] : memref<16x256xf32, #tpu.memory_space<vmem>>, vector<16x128xf32>
    %72 = arith.maximumf %67, %71 : vector<16x128xf32>
    %c0_36 = arith.constant 0 : index
    %c8_37 = arith.constant 8 : index
    %73 = vector.load %arg4[%c0_36, %c8_37] : memref<16x256xf32, #tpu.memory_space<vmem>>, vector<16x128xf32>
    %c0_38 = arith.constant 0 : index
    %c9 = arith.constant 9 : index
    %74 = vector.load %arg4[%c0_38, %c9] : memref<16x256xf32, #tpu.memory_space<vmem>>, vector<16x128xf32>
    %75 = arith.maximumf %73, %74 : vector<16x128xf32>
    %76 = arith.maximumf %72, %75 : vector<16x128xf32>
    %77 = vector.broadcast %32 : vector<16x1xf32> to vector<16x128xf32>
    %78 = arith.addf %76, %77 : vector<16x128xf32>
    %cst_39 = arith.constant 0.000000e+00 : f32
    %79 = vector.broadcast %cst_39 : f32 to vector<16x128xf32>
    %80 = arith.maximumf %78, %79 : vector<16x128xf32>
    %cst_40 = arith.constant 0.000000e+00 : f32
    %81 = vector.broadcast %cst_40 : f32 to vector<16x256xf32>
    %c0_41 = arith.constant 0 : index
    %c0_42 = arith.constant 0 : index
    %82 = vector.load %arg5[%c0_41, %c0_42] : memref<16x256xf32, #tpu.memory_space<vmem>>, vector<16x256xf32>
    tpu.vector_store %arg5[%c0_41, %c0_42], %81 {strides = array<i32>} : memref<16x256xf32, #tpu.memory_space<vmem>>, vector<16x256xf32>,
    %c0_43 = arith.constant 0 : index
    %c128_44 = arith.constant 128 : index
    %83 = vector.load %arg5[%c0_43, %c128_44] : memref<16x256xf32, #tpu.memory_space<vmem>>, vector<16x128xf32>
    tpu.vector_store %arg5[%c0_43, %c128_44], %80 {strides = array<i32>} : memref<16x256xf32, #tpu.memory_space<vmem>>, vector<16x128xf32>,
    %c0_45 = arith.constant 0 : index
    %c110 = arith.constant 110 : index
    %84 = vector.load %arg5[%c0_45, %c110] : memref<16x256xf32, #tpu.memory_space<vmem>>, vector<16x128xf32>
    %cst_46 = arith.constant 0.000000e+00 : f32
    %85 = vector.shape_cast %11 : vector<1x128xi1> to vector<1x128xi1>
    %86 = vector.broadcast %85 : vector<1x128xi1> to vector<16x128xi1>
    %87 = vector.broadcast %cst_46 : f32 to vector<16x128xf32>
    %88 = arith.select %86, %84, %87 : vector<16x128xi1>, vector<16x128xf32>
    %c0_47 = arith.constant 0 : index
    %c112 = arith.constant 112 : index
    %89 = vector.load %arg5[%c0_47, %c112] : memref<16x256xf32, #tpu.memory_space<vmem>>, vector<16x128xf32>
    %cst_48 = arith.constant 0.000000e+00 : f32
    %90 = vector.shape_cast %10 : vector<1x128xi1> to vector<1x128xi1>
    %91 = vector.broadcast %90 : vector<1x128xi1> to vector<16x128xi1>
    %92 = vector.broadcast %cst_48 : f32 to vector<16x128xf32>
    %93 = arith.select %91, %89, %92 : vector<16x128xi1>, vector<16x128xf32>
    %c0_49 = arith.constant 0 : index
    %c126 = arith.constant 126 : index
    %94 = vector.load %arg5[%c0_49, %c126] : memref<16x256xf32, #tpu.memory_space<vmem>>, vector<16x128xf32>
    %cst_50 = arith.constant 0.000000e+00 : f32
    %95 = vector.shape_cast %8 : vector<1x128xi1> to vector<1x128xi1>
    %96 = vector.broadcast %95 : vector<1x128xi1> to vector<16x128xi1>
    %97 = vector.broadcast %cst_50 : f32 to vector<16x128xf32>
    %98 = arith.select %96, %94, %97 : vector<16x128xi1>, vector<16x128xf32>
    %99 = tpu.concatenate %88, %93, %98, %80 in 0 : vector<16x128xf32>, vector<16x128xf32>, vector<16x128xf32>, vector<16x128xf32> -> vector<64x128xf32>
    %cst_51 = arith.constant dense<0.000000e+00> : vector<32x128xf32>
    %100 = tpu.matmul %33, %99, %cst_51 {dimension_numbers = #tpu.dot_dimension_numbers<[1], [0], [0], [1], [0, 0, 1, 1], [], []>} : vector<32x64xf32>, vector<64x128xf32>, vector<32x128xf32> -> vector<32x128xf32>
    %101 = arith.andi %20, %24 : vector<1x128xi1>
    %cst_52 = arith.constant 0xFF800000 : f32
    %102 = vector.shape_cast %101 : vector<1x128xi1> to vector<1x128xi1>
    %103 = vector.broadcast %102 : vector<1x128xi1> to vector<32x128xi1>
    %104 = vector.broadcast %cst_52 : f32 to vector<32x128xf32>
    %105 = arith.select %103, %100, %104 : vector<32x128xi1>, vector<32x128xf32>
    %cst_53 = arith.constant dense<0xFF800000> : vector<32xf32>
    %106 = vector.multi_reduction <maximumf>, %105, %cst_53 [1] : vector<32x128xf32> to vector<32xf32>
    %107 = vector.shape_cast %106 : vector<32xf32> to vector<32x1xf32>
    %108 = arith.andi %20, %28 : vector<1x128xi1>
    %cst_54 = arith.constant 0xFF800000 : f32
    %109 = vector.shape_cast %108 : vector<1x128xi1> to vector<1x128xi1>
    %110 = vector.broadcast %109 : vector<1x128xi1> to vector<32x128xi1>
    %111 = vector.broadcast %cst_54 : f32 to vector<32x128xf32>
    %112 = arith.select %110, %100, %111 : vector<32x128xi1>, vector<32x128xf32>
    %cst_55 = arith.constant dense<0xFF800000> : vector<32xf32>
    %113 = vector.multi_reduction <maximumf>, %112, %cst_55 [1] : vector<32x128xf32> to vector<32xf32>
    %114 = vector.shape_cast %113 : vector<32xf32> to vector<32x1xf32>
    %115 = tpu.iota {dimensions = array<i32: 1>} : vector<32x2xi32>
    %c1_i32_56 = arith.constant 1 : i32
    %116 = vector.broadcast %c1_i32_56 : i32 to vector<32x2xi32>
    %117 = arith.cmpi eq, %115, %116 : vector<32x2xi32>
    %118 = vector.shape_cast %114 : vector<32x1xf32> to vector<32x1xf32>
    %119 = vector.broadcast %118 : vector<32x1xf32> to vector<32x2xf32>
    %120 = vector.shape_cast %107 : vector<32x1xf32> to vector<32x1xf32>
    %121 = vector.broadcast %120 : vector<32x1xf32> to vector<32x2xf32>
    %122 = arith.select %117, %119, %121 : vector<32x2xi1>, vector<32x2xf32>
    %123 = vector.broadcast %34 : vector<32x1xf32> to vector<32x2xf32>
    %124 = arith.addf %122, %123 : vector<32x2xf32>
    %cst_57 = arith.constant 0.000000e+00 : f32
    %125 = vector.broadcast %cst_57 : f32 to vector<32x2xf32>
    %126 = arith.maximumf %124, %125 : vector<32x2xf32>
    %c0_58 = arith.constant 0 : index
    %c0_59 = arith.constant 0 : index
    %127 = vector.load %arg2[%c0_58, %c0_59] : memref<32x2xf32, #tpu.memory_space<vmem>>, vector<32x2xf32>
    tpu.vector_store %arg2[%c0_58, %c0_59], %126 {strides = array<i32>} : memref<32x2xf32, #tpu.memory_space<vmem>>, vector<32x2xf32>,
    return
  }
}

</mosaic_0001>

<bundles_post_ra>
// kernel: encoder_pallas.1
= control target key start
LH: loop header
LB: loop body
LE: loop exit
PB: predicated region body
PF: predicated region fallthrough
CT: control target
= control target key end

     0   :  { %vm44_vm0 = vcmask 1043456   ;;  %v789_v2 = vmov 0.0   ;;  %v790_v4 = vmov 64   ;;  %vm40_vm1 = vcmask 31744   ;;  %s791_s16 = smov 8   ;;  %s792_s17 = smov 9   ;;  %s948_s0 = inlined_call_operand.vmem [shape: f32[4,512], index: 0, kind: input, shape index: {}]   ;;  %s949_s1 = inlined_call_operand.vmem [shape: f32[56,65], index: 1, kind: input, shape index: {}]   ;;  %s950_s2 = inlined_call_operand.vmem [shape: f32[32,2], index: 2, kind: output, shape index: {}]  }
   0x1   :  { %v34_v0 = vld [vmem:[%s948_s0] sm:$0xff]  ;;  %v35_v1 = vld [vmem:[%s948_s0 + $0x8] sm:$0xff]  ;;  %117 = vmatprep.mubr.f32.mxu0 %v789_v2  ;;  %730 = vset.pattern.permute.xlu0 %v790_v4  ;;  %vm241_vm2 = vcmask 261120   ;;  %s793_s18 = smov 1   ;;  %s794_s19 = smov 127   ;;  %v11_v19 = vlaneseq  ;;  %vm227_vm5 = vcmask 64512  }
   0x2   :  { %v27_v3 = vld [vmem:[%s949_s1] sm:$0xff]  ;;  %v38_v5 = vcombine.high %v34_v0, %v34_v0  ;;  %v39_v6 = vcombine.high %v35_v1, %v35_v1  ;;  %751 = vset.pattern.permute.xlu1 %v790_v4  ;;  %v28_v17 = vld [vmem:[%s949_s1 + $0x8] sm:$0xff]  ;;  %vm217_vm6 = vcmask 72704   ;;  %vm237_vm9 = vcmask 7168   ;;  %v29_v40 = vld [vmem:[%s949_s1 + $0x10] sm:$0xff]  ;;  %s796_s22 = smov 120  }
   0x3   :  { %199 = vperm.xlu0 %730, %v27_v3   ;;  %v833_v20 = vand.u32 127, %v11_v19  ;;  %vm795_vm10 = vmmov 1   ;;  %vm345_vm12 = vcmask 1039360   ;;  %vm370_vm13 = vcmask 982016   ;;  %s797_s23 = smov 18   ;;  %s798_s24 = smov 16  }
   0x4   :  { %613 = vmatprep.subr.msk.mxu0 %vm44_vm0, %v38_v5  ;;  %s799_s25 = smov 2   ;;  %vm448_vm14 = vcmask 523264   ;;  %vm411_vm15 = vcmask 146432   ;;  %v33_v24 = vld [vmem:[%s949_s1 + $0x30] sm:$0xff] }
   0x5   :  { %614 = vmatpush1.msk.msra.mxu0 %vm44_vm0, %v34_v0  ;;  %v14_v21 = vshra.s32 %v833_v20, 3  ;;  %v13_v22 = vand.u32 7, %v833_v20 }
   0x6   :  { %615 = vmatmul.mubr.msk.f32.vlgmr.msra.gmra.mrb[0].mxu0 %vm40_vm1, %v27_v3  ;;  %616 = vmatprep.subr.msk.mxu0 %vm44_vm0, %v39_v6 }
   0x7   :  { %617 = vmatpush1.msk.msra.mxu0 %vm44_vm0, %v35_v1  ;;  %188 = vmatprep.mubr.f32.mxu0 %v789_v2  ;;  %v837_v23 = vand.u32 7, %v14_v21  ;;  %vm841_vm3 = vcmp.gt.s32.totalorder %v13_v22, 0 }
   0x8   :  { %vm692_vm11 = vmpackc.low %vm795_vm10, %vm841_vm3 }
   0x9   :  { %vm17_vm4 = vcmp.gt.s32.totalorder %v837_v23, 0 }
   0xa   :  { %618 = vmatmul.mubr.msk.f32.vlgmr.msra.gmra.mrb[2].mxu0 %vm40_vm1, %v27_v3  ;;  %vm850_vm7 = vmand %vm17_vm4, %vm841_vm3  ;;  %vm426_vm1 = vcmask 130048  }
   0xb   :  { %660 = vmatprep.mubr.msk.f32.mxu0 %vm241_vm2, %v28_v17  ;;  %vm686_vm8 = vmpackc.low %vm17_vm4, %vm850_vm7 }
   0xc   :  { %vm698_vm0 = vmpackc.low %vm850_vm7, %vm850_vm7 }
  0x82   :  { %v200_v13 = vpop.permute.xlu0 %199 }
  0xd9   :  { %v119_v7 = vpop.f32.mrb[0].mxu0 }
  0xda   :  { %v121_v8 = vpop.f32.mrb[1].mxu0 }
  0xdb   :  { %v195_v9 = vmax.f32 %v119_v7, %v121_v8 }
  0xdd   :  { %v190_v10 = vpop.f32.mrb[2].mxu0 }
  0xde   :  { %v192_v11 = vpop.f32.mrb[3].mxu0 }
  0xdf   :  { %v196_v12 = vmax.f32 %v190_v10, %v192_v11  ;;  %v30_v10 = vld [vmem:[%s949_s1 + $0x18] sm:$0xff] }
  0xe0   :  { %679 = vmatprep.mubr.msk.f32.mxu1 %vm448_vm14, %v30_v10 }
  0xe1   :  { %v197_v14 = vmax.f32 %v195_v9, %v196_v12 }
  0xe3   :  { %v202_v15 = vadd.f32 %v200_v13, %v197_v14 }
  0xe5   :  { %v203_v16 = vmax.f32 %v202_v15, 0.0 }
  0xe7   :  { %v736_v18 = vpack.i.bf16 %v203_v16, %v789_v2 }
  0xe9   :  { %737 = vrot.lane.b32.xlu1 %v736_v18, %s791_s16  ;;  %732 = vrot.lane.b32.xlu0 %v736_v18, %s792_s17 }
  0xed   :  { %742 = vrot.lane.b32.xlu1 %v736_v18, %s793_s18 }
  0xf1   :  { %747 = vrot.lane.b32.xlu1 %v789_v2, %s794_s19 }
  0xf5   :  { %378 = vperm.xlu1 %751, %v28_v17  }
 0x15b   :  { %v738_v25 = vpop.permute.xlu1 %737  ;;  %v733_v26 = vpop.permute.xlu0 %732 }
 0x15c   :  { %v740_v28 = vunpack.i.h.bf16 %v738_v25  ;;  %v739_v29 = vunpack.i.l.bf16 %v738_v25  ;;  %v735_v30 = vunpack.i.h.bf16 %v733_v26  ;;  %v734_v31 = vunpack.i.l.bf16 %v733_v26 }
 0x15e   :  { %v228_v32 = vsel %vm227_vm5, %v739_v29, %v740_v28  ;;  %v218_v33 = vsel %vm217_vm6, %v734_v31, %v735_v30  ;;  %vm441_vm5 = vcmask 15360   ;;  %vm710_vm6 = vmpackc.low %vm841_vm3, %vm841_vm3 }
 0x15f   :  { %v685_v34 = vpack.c.bf16 %v228_v32, %v218_v33  ;;  %v743_v35 = vpop.permute.xlu1 %742 }
 0x160   :  { %v745_v36 = vunpack.i.h.bf16 %v743_v35  ;;  %v744_v37 = vunpack.i.l.bf16 %v743_v35 }
 0x161   :  { %687 = vmatprep.subr.msk.bf16.mxu0 %vm686_vm8, %v685_v34 }
 0x162   :  { %v238_v38 = vsel %vm237_vm9, %v744_v37, %v745_v36  ;;  %690 = vmatpush3.bf16.msk.msra.mxu0 %vm686_vm8, %v685_v34 }
 0x163   :  { %v691_v39 = vpack.c.bf16 %v203_v16, %v238_v38  ;;  %v748_v41 = vpop.permute.xlu1 %747 }
 0x164   :  { %v750_v44 = vunpack.i.h.bf16 %v748_v41  ;;  %v749_v45 = vunpack.i.l.bf16 %v748_v41  ;;  %v31_v41 = vld [vmem:[%s949_s1 + $0x20] sm:$0xff] }
 0x165   :  { %693 = vmatprep.subr.msk.bf16.mxu0 %vm692_vm11, %v691_v39 }
 0x166   :  { %696 = vmatpush3.bf16.msk.msra.mxu0 %vm692_vm11, %v691_v39  ;;  %v357_v46 = vmax.f32 %v750_v44, 0.0  ;;  %v355_v47 = vmax.f32 %v749_v45, 0.0 }
 0x168   :  { %v752_v48 = vpack.i.bf16 %v357_v46, %v355_v47 }
 0x169   :  { %661 = vmatmul.mubr.msk.f32.vlgmr.msra.gmra.mrb[4].mxu0 %vm241_vm2, %v29_v40  ;;  %vm704_vm2 = vmpackc.low %vm17_vm4, %vm17_vm4 }
 0x174   :  { %v379_v56 = vpop.permute.xlu1 %378 }
 0x23c   :  { %v662_v42 = vpop.f32.mrb[4].mxu0 }
 0x23d   :  { %v314_v43 = vpop.f32.mrb[5].mxu0 }
 0x23e   :  { %337 = vrot.lane.b32.xlu0 %v314_v43, %s794_s19 }
 0x242   :  { %341 = vrot.lane.b32.xlu0 %v662_v42, %s794_s19 }
 0x246   :  { %382 = vperm.xlu0 %730, %v29_v40  }
 0x24a   :  { %753 = vrot.lane.b32.xlu0 %v752_v48, %s796_s22 }
 0x2b0   :  { %v338_v49 = vpop.permute.xlu0 %337 }
 0x2b1   :  { %v346_v50 = vsel %vm345_vm12, %v338_v49, %v749_v45  ;;  %v24_v45 = vshra.s32 %v833_v20, 6 }
 0x2b2   :  { %v350_v51 = vmax.f32 %v314_v43, %v346_v50  ;;  %v19_v43 = vand.u32 1, %v837_v23 }
 0x2b3   :  { %vm26_vm8 = vcmp.eq.s32.totalorder %v24_v45, 1  ;;  %vm25_vm9 = vcmp.eq.s32.totalorder %v24_v45, 0 }
 0x2b4   :  { %362 = vrot.lane.b32.xlu1 %v350_v51, %s796_s22  ;;  %v342_v52 = vpop.permute.xlu0 %341  ;;  %vm20_vm3 = vcmp.eq.s32.totalorder %v19_v43, 0 }
 0x2b5   :  { %v347_v53 = vsel %vm345_vm12, %v342_v52, %v750_v44  ;;  %v21_v44 = vand.u32 1, %v13_v22  ;;  %vm576_vm12 = vcmp.eq.s32.totalorder %v833_v20, 1 }
 0x2b6   :  { %v351_v54 = vmax.f32 %v662_v42, %v347_v53  ;;  %v32_v42 = vld [vmem:[%s949_s1 + $0x28] sm:$0xff] }
 0x2b7   :  { %vm22_vm4 = vcmp.eq.s32.totalorder %v21_v44, 0 }
 0x2b8   :  { %366 = vrot.lane.b32.xlu1 %v351_v54, %s796_s22  ;;  %vm23_vm7 = vmand %vm20_vm3, %vm22_vm4 }
 0x2b9   :  { %vm899_vm10 = vmand %vm23_vm7, %vm26_vm8 }
 0x2ba   :  { %vm903_vm11 = vmand %vm23_vm7, %vm25_vm9 }
 0x2c5   :  { %v383_v55 = vpop.permute.xlu0 %382 }
 0x2c9   :  { %v754_v57 = vpop.permute.xlu0 %753 }
 0x2ca   :  { %v755_v58 = vunpack.i.l.bf16 %v754_v57  ;;  %v756_v60 = vunpack.i.h.bf16 %v754_v57 }
 0x326   :  { %v363_v59 = vpop.permute.xlu1 %362 }
 0x327   :  { %v371_v61 = vsel %vm370_vm13, %v363_v59, %v755_v58 }
 0x328   :  { %v375_v62 = vmax.f32 %v350_v51, %v371_v61 }
 0x32a   :  { %v385_v63 = vadd.f32 %v379_v56, %v375_v62  ;;  %v367_v0 = vpop.permute.xlu1 %366 }
 0x32b   :  { %v372_v1 = vsel %vm370_vm13, %v367_v0, %v756_v60 }
 0x32c   :  { %v387_v3 = vmax.f32 %v385_v63, 0.0  ;;  %v376_v4 = vmax.f32 %v351_v54, %v372_v1 }
 0x32e   :  { %v386_v5 = vadd.f32 %v383_v55, %v376_v4  ;;  %v767_v6 = vpack.i.bf16 %v387_v3, %v789_v2 }
 0x330   :  { %v388_v7 = vmax.f32 %v386_v5, 0.0  ;;  %768 = vrot.lane.b32.xlu0 %v767_v6, %s797_s23 }
 0x332   :  { %v757_v8 = vpack.i.bf16 %v388_v7, %v789_v2  ;;  %v715_v9 = vpack.c.bf16 %v388_v7, %v387_v3 }
 0x334   :  { %758 = vrot.lane.b32.xlu1 %v757_v8, %s797_s23  ;;  %773 = vrot.lane.b32.xlu0 %v767_v6, %s798_s24 }
 0x338   :  { %763 = vrot.lane.b32.xlu1 %v757_v8, %s798_s24  ;;  %778 = vrot.lane.b32.xlu0 %v767_v6, %s799_s25 }
 0x33c   :  { %783 = vrot.lane.b32.xlu1 %v757_v8, %s799_s25 }
 0x340   :  { %582 = vperm.xlu1 %751, %v30_v10  }
 0x3a2   :  { %v769_v11 = vpop.permute.xlu0 %768 }
 0x3a3   :  { %v771_v12 = vunpack.i.h.bf16 %v769_v11  ;;  %v770_v13 = vunpack.i.l.bf16 %v769_v11 }
 0x3a5   :  { %v412_v19 = vsel %vm411_vm15, %v770_v13, %v771_v12 }
 0x3a6   :  { %v759_v2 = vpop.permute.xlu1 %758  ;;  %v774_v14 = vpop.permute.xlu0 %773 }
 0x3a7   :  { %v761_v15 = vunpack.i.h.bf16 %v759_v2  ;;  %v760_v16 = vunpack.i.l.bf16 %v759_v2  ;;  %v776_v17 = vunpack.i.h.bf16 %v774_v14  ;;  %v775_v18 = vunpack.i.l.bf16 %v774_v14 }
 0x3a9   :  { %v413_v21 = vsel %vm411_vm15, %v760_v16, %v761_v15  ;;  %v427_v31 = vsel %vm426_vm1, %v775_v18, %v776_v17 }
 0x3aa   :  { %v764_v25 = vpop.permute.xlu1 %763  ;;  %v779_v26 = vpop.permute.xlu0 %778  ;;  %v697_v28 = vpack.c.bf16 %v413_v21, %v412_v19 }
 0x3ab   :  { %v766_v29 = vunpack.i.h.bf16 %v764_v25  ;;  %v765_v30 = vunpack.i.l.bf16 %v764_v25  ;;  %v781_v33 = vunpack.i.h.bf16 %v779_v26  ;;  %v780_v34 = vunpack.i.l.bf16 %v779_v26 }
 0x3ac   :  { %699 = vmatprep.subr.msk.bf16.mxu1 %vm698_vm0, %v697_v28 }
 0x3ad   :  { %v428_v32 = vsel %vm426_vm1, %v765_v30, %v766_v29  ;;  %702 = vmatpush3.bf16.msk.msra.mxu1 %vm698_vm0, %v697_v28  ;;  %v442_v38 = vsel %vm441_vm5, %v780_v34, %v781_v33 }
 0x3ae   :  { %v703_v35 = vpack.c.bf16 %v428_v32, %v427_v31  ;;  %v784_v27 = vpop.permute.xlu1 %783 }
 0x3af   :  { %v786_v36 = vunpack.i.h.bf16 %v784_v27  ;;  %v785_v37 = vunpack.i.l.bf16 %v784_v27 }
 0x3b0   :  { %705 = vmatprep.subr.msk.bf16.mxu1 %vm704_vm2, %v703_v35 }
 0x3b1   :  { %v443_v39 = vsel %vm441_vm5, %v785_v37, %v786_v36  ;;  %708 = vmatpush3.bf16.msk.msra.mxu1 %vm704_vm2, %v703_v35 }
 0x3b2   :  { %v709_v40 = vpack.c.bf16 %v443_v39, %v442_v38 }
 0x3b4   :  { %711 = vmatprep.subr.msk.bf16.mxu1 %vm710_vm6, %v709_v40 }
 0x3b5   :  { %714 = vmatpush3.bf16.msk.msra.mxu1 %vm710_vm6, %v709_v40 }
 0x3b6   :  { %716 = vmatprep.subr.bf16.mxu1 %v715_v9 }
 0x3b9   :  { %718 = vmatpush3.bf16.msra.mxu1 %v715_v9 }
 0x3bc   :  { %680 = vmatmul.mubr.msk.f32.vlgmr.msra.gmra.mrb[0].mxu1 %vm448_vm14, %v31_v41 }
 0x3bd   :  { %682 = vmatprep.mubr.msk.f32.mxu1 %vm448_vm14, %v32_v42 }
 0x3bf   :  { %v583_v58 = vpop.permute.xlu1 %582 }
 0x3c0   :  { %683 = vmatmul.mubr.msk.f32.gmra.mrb[2].mxu1 %vm448_vm14, %v33_v24 }
 0x48f   :  { %v681_v48 = vpop.f32.mrb[0].mxu1 }
 0x490   :  { %v527_v23 = vpop.f32.mrb[1].mxu1  ;;  %v565_v22 = vsel %vm899_vm10, %v681_v48, -inf  ;;  %v550_v49 = vsel %vm903_vm11, %v681_v48, -inf }
 0x491   :  { %570 = vmax.xlane.f32.xlu0 %v565_v22  ;;  %555 = vmax.xlane.f32.xlu1 %v550_v49  ;;  %v564_v51 = vsel %vm899_vm10, %v527_v23, -inf  ;;  %v549_v52 = vsel %vm903_vm11, %v527_v23, -inf }
 0x493   :  { %v684_v50 = vpop.f32.mrb[2].mxu1 }
 0x494   :  { %v537_v53 = vpop.f32.mrb[3].mxu1  ;;  %v552_v54 = vsel %vm903_vm11, %v684_v50, -inf  ;;  %v567_v55 = vsel %vm899_vm10, %v684_v50, -inf }
 0x495   :  { %568 = vmax.xlane.f32.xlu1 %v564_v51  ;;  %553 = vmax.xlane.f32.xlu0 %v549_v52  ;;  %v551_v56 = vsel %vm903_vm11, %v537_v53, -inf  ;;  %v566_v57 = vsel %vm899_vm10, %v537_v53, -inf }
 0x499   :  { %559 = vmax.xlane.f32.xlu0 %v552_v54 }
 0x49d   :  { %574 = vmax.xlane.f32.xlu0 %v567_v55 }
 0x4a1   :  { %557 = vmax.xlane.f32.xlu0 %v551_v56 }
 0x4a6   :  { %590 = vperm.xlu1 %751, %v32_v42  }
 0x4b7   :  { %586 = vperm.xlu0 %730, %v31_v41  }
 0x4ca   :  { %572 = vmax.xlane.f32.xlu1 %v566_v57 }
 0x4db   :  { %594 = vperm.xlu1 %751, %v33_v24  }
 0x51e   :  { %v571_v59 = vpop.xlane.xlu0 %570  ;;  %v556_v60 = vpop.xlane.xlu1 %555 }
 0x51f   :  { %v578_v6 = vsel %vm576_vm12, %v571_v59, %v556_v60 }
 0x522   :  { %v569_v61 = vpop.xlane.xlu1 %568  ;;  %v554_v62 = vpop.xlane.xlu0 %553 }
 0x523   :  { %v577_v63 = vsel %vm576_vm12, %v569_v61, %v554_v62 }
 0x524   :  { %v597_v0 = vadd.f32 %v583_v58, %v577_v63 }
 0x526   :  { %v601_v1 = vmax.f32 %v597_v0, 0.0  ;;  %v560_v3 = vpop.xlane.xlu0 %559  ;;  %v591_v10 = vpop.permute.xlu1 %590 }
 0x528   :  { %605 = vst.msk [vmem:[%s950_s2] sm:$0xff] %vm441_vm5, %v601_v1 }
 0x52a   :  { %v575_v4 = vpop.xlane.xlu0 %574 }
 0x52b   :  { %v580_v14 = vsel %vm576_vm12, %v575_v4, %v560_v3 }
 0x52e   :  { %v558_v5 = vpop.xlane.xlu0 %557 }
 0x536   :  { %v587_v7 = vpop.permute.xlu0 %586 }
 0x537   :  { %v598_v8 = vadd.f32 %v587_v7, %v578_v6 }
 0x539   :  { %v602_v9 = vmax.f32 %v598_v8, 0.0 }
 0x53b   :  { %606 = vst.msk [vmem:[%s950_s2 + $0x8] sm:$0xff] %vm441_vm5, %v602_v9 }
 0x557   :  { %v573_v11 = vpop.xlane.xlu1 %572 }
 0x558   :  { %v579_v12 = vsel %vm576_vm12, %v573_v11, %v558_v5 }
 0x559   :  { %v599_v13 = vadd.f32 %v591_v10, %v579_v12 }
 0x55b   :  { %v603_v2 = vmax.f32 %v599_v13, 0.0  ;;  %v595_v15 = vpop.permute.xlu1 %594 }
 0x55c   :  { %v600_v16 = vadd.f32 %v595_v15, %v580_v14 }
 0x55d   :  { %607 = vst.msk [vmem:[%s950_s2 + $0x10] sm:$0xff] %vm441_vm5, %v603_v2 }
 0x55e   :  { %v604_v17 = vmax.f32 %v600_v16, 0.0 }
 0x560   :  { %608 = vst.msk [vmem:[%s950_s2 + $0x18] sm:$0xff] %vm441_vm5, %v604_v17 }

</bundles_post_ra>
